<compile_context>
chip_gen: v7x
topology: tpu7x:2x2x1
jax: 0.10.0
libtpu: 0.0.40
codegen_flags: <defaults>
</compile_context>

<pallas_src>
import jax
import jax.numpy as jnp
from jax import lax
from jax.experimental import pallas as pl
from jax.experimental.pallas import tpu as pltpu

EPS = 1e-5


def _bn_edge_kernel(x_ref, gamma_ref, beta_ref, o_ref):
    # x_ref:     (Bk, TH, Mk)  edge features for TH independent channels
    # gamma_ref: (TH, 1)       per-channel scale (f32)
    # beta_ref:  (TH, 1)       per-channel shift (f32)
    # o_ref:     (Bk, TH, Mk)
    x = x_ref[...]
    count = x.shape[0] * x.shape[2]          # elements per channel
    inv_count = 1.0 / count

    # One-pass per-channel batch statistics, accumulated in f32.
    xf = x.astype(jnp.float32)
    s1 = jnp.sum(xf, axis=(0, 2), keepdims=True)        # (1, TH, 1)
    s2 = jnp.sum(xf * xf, axis=(0, 2), keepdims=True)   # (1, TH, 1)
    mean = s1 * inv_count
    var = jnp.maximum(s2 * inv_count - mean * mean, 0.0)  # biased, clamped >= 0
    inv_std = lax.rsqrt(var + EPS)

    gamma = gamma_ref[...][None, :, :]                   # (1, TH, 1)
    beta = beta_ref[...][None, :, :]                     # (1, TH, 1)

    # Fused affine: y = x * scale + shift (one multiply-add per element).
    scale = gamma * inv_std
    shift = beta - mean * scale
    o_ref[...] = (xf * scale + shift).astype(o_ref.dtype)


def _working_set_bytes(b, th, m, itemsize):
    """Per-grid-step VMEM footprint: double-buffered input + output tiles
    plus ~one f32 tile of in-kernel intermediates."""
    tile_elems = b * th * m
    return tile_elems * (4 * itemsize + 4)


def _vmem_capacity_bytes():
    try:
        return int(pltpu.get_tpu_info().vmem_capacity_bytes)
    except Exception:
        return 64 * 1024 * 1024   # conservative: v7x per-TensorCore VMEM


def _choose_tile_h(H, b, m, itemsize, budget_bytes):
    """Largest channel tile that divides H, satisfies the sublane rule
    (TH % 8 == 0 or TH == H), fits the VMEM budget, and (when possible)
    leaves >= 2 grid steps so the 'parallel' axis can be split across
    TensorCores.  Returns None if nothing fits (caller falls back to XLA)."""
    cands = sorted({d for d in range(8, H + 1, 8) if H % d == 0} | {H})
    fitting = [c for c in cands
               if _working_set_bytes(b, c, m, itemsize) <= budget_bytes]
    if not fitting:
        return None
    multi = [c for c in fitting if H // c >= 2]
    return max(multi) if multi else max(fitting)


def _batch_norm_edge_xla(e, gamma, beta):
    """Pure-JAX reference / fallback (identical math)."""
    ef = e.astype(jnp.float32)
    mean = jnp.mean(ef, axis=(0, 2, 3), keepdims=True)
    var = jnp.mean(jnp.square(ef - mean), axis=(0, 2, 3), keepdims=True)
    y = (ef - mean) * lax.rsqrt(var + EPS)
    y = y * gamma[None, :, None, None] + beta[None, :, None, None]
    return y.astype(e.dtype)


def batch_norm_edge(e, gamma, beta, tile_h=None):
    """BatchNormEdge forward. e: (B, H, N, N); gamma, beta: (H,)."""
    B, H, N1, N2 = e.shape
    M = N1 * N2
    itemsize = jnp.dtype(e.dtype).itemsize

    # Lane-density guard: for tiny graphs (N*N < 128) present a channel-major
    # (1, H, B*N*N) slab so output stores are as lane-dense as possible.  The
    # extra transpose is negligible at these sizes.  Otherwise use the free
    # (B, H, N*N) view (last two dims contiguous).
    channel_major = M < 128
    if channel_major:
        x = e.reshape(B, H, M).transpose(1, 0, 2).reshape(1, H, B * M)
        kb, km = 1, B * M
    else:
        x = e.reshape(B, H, M)
        kb, km = B, M

    capacity = _vmem_capacity_bytes()
    budget = capacity // 2     # generation-aware; leaves pipelining headroom

    if tile_h is None:
        TH = _choose_tile_h(H, kb, km, itemsize, budget)
        if TH is None:
            # A single channel's (B, N*N) slab does not fit double-buffered in
            # VMEM on this chip; use plain XLA rather than spill / fail.
            # TODO(synk): add a two-pass Pallas path (grid over B/M with f32
            # sum/sum-sq scratch accumulators) for very large B * N * N.
            return _batch_norm_edge_xla(e, gamma, beta)
    else:
        TH = tile_h
        assert H % TH == 0, "tile_h must divide hidden_dim"
        assert TH % 8 == 0 or TH == H, "tile_h must be a multiple of 8 or equal H"

    gamma2 = gamma.reshape(H, 1).astype(jnp.float32)
    beta2 = beta.reshape(H, 1).astype(jnp.float32)

    # Explicit scoped-VMEM limit derived from the chosen tile (the defaults —
    # 16 MiB on v5e, 32 MiB on v6e/v7x — would otherwise cap the tile size).
    ws = _working_set_bytes(kb, TH, km, itemsize)
    vmem_limit = int(min(capacity * 3 // 4,
                         max(3 * ws // 2 + (2 << 20), 32 << 20)))
    vmem_limit = int(max(vmem_limit, ws + (1 << 20)))

    out = pl.pallas_call(
        _bn_edge_kernel,
        out_shape=jax.ShapeDtypeStruct((kb, H, km), e.dtype),
        grid_spec=pl.GridSpec(
            grid=(H // TH,),
            in_specs=[
                pl.BlockSpec((kb, TH, km), lambda h: (0, h, 0)),
                pl.BlockSpec((TH, 1), lambda h: (h, 0)),
                pl.BlockSpec((TH, 1), lambda h: (h, 0)),
            ],
            out_specs=pl.BlockSpec((kb, TH, km), lambda h: (0, h, 0)),
        ),
        compiler_params=pltpu.CompilerParams(
            dimension_semantics=("parallel",),   # channel tiles are independent
            vmem_limit_bytes=vmem_limit,
        ),
    )(x, gamma2, beta2)

    if channel_major:
        out = out.reshape(H, B, M).transpose(1, 0, 2)
    return out.reshape(B, H, N1, N2)


if __name__ == "__main__":
    key = jax.random.PRNGKey(0)
    k_e, k_g, k_b = jax.random.split(key, 3)

    B, H, N = 2, 32, 8   # (batch_size, hidden_dim, num_nodes)
    gamma = 1.0 + 0.1 * jax.random.normal(k_g, (H,), dtype=jnp.float32)
    beta = 0.1 * jax.random.normal(k_b, (H,), dtype=jnp.float32)

    # 1) Tiny graph (N*N = 64 < 128): exercises the lane-dense channel-major
    #    path; auto tile picks TH=16 -> grid=(2,).
    e_small = jax.random.normal(k_e, (B, H, N, N), dtype=jnp.float32)
    out_small = jax.block_until_ready(batch_norm_edge(e_small, gamma, beta))
    ref_small = _batch_norm_edge_xla(e_small, gamma, beta)
    assert jnp.allclose(out_small, ref_small, atol=1e-4, rtol=1e-4), "mismatch (small graph)"

    # 2) Larger graph (N*N = 256 >= 128): row-major lane-dense path, auto tile.
    e_big = jax.random.normal(k_e, (B, H, 16, 16), dtype=jnp.float32)
    out_big = jax.block_until_ready(batch_norm_edge(e_big, gamma, beta))
    ref_big = _batch_norm_edge_xla(e_big, gamma, beta)
    assert jnp.allclose(out_big, ref_big, atol=1e-4, rtol=1e-4), "mismatch (large graph)"

    # 3) Forced small tile (grid=(4,)) to validate per-channel gamma/beta
    #    block alignment across multiple channel tiles.
    out_tiled = jax.block_until_ready(batch_norm_edge(e_big, gamma, beta, tile_h=8))
    assert jnp.allclose(out_tiled, ref_big, atol=1e-4, rtol=1e-4), "mismatch (tiled)"

    print("KERNEL_OK")
</pallas_src>

<mosaic_0001>
module attributes {stable_mosaic.version = 11 : i64} {
  func.func @_bn_edge_kernel(%arg0: i32, %arg1: memref<1x16x128xf32, #tpu.memory_space<vmem>>, %arg2: memref<16x1xf32, #tpu.memory_space<vmem>>, %arg3: memref<16x1xf32, #tpu.memory_space<vmem>>, %arg4: memref<1x16x128xf32, #tpu.memory_space<vmem>>) attributes {dimension_semantics = [#tpu.dimension_semantics<parallel>], iteration_bounds = array<i64: 2>, scalar_prefetch = 0 : i64, scratch_operands = 0 : i64, tpu.core_type = #tpu.core_type<tc>, window_params = [{transform_indices = @transform_0, window_bounds = array<i64: 1, 16, 128>}, {transform_indices = @transform_1, window_bounds = array<i64: 16, 1>}, {transform_indices = @transform_2, window_bounds = array<i64: 16, 1>}, {transform_indices = @transform_3, window_bounds = array<i64: 1, 16, 128>}]} {
    %c0 = arith.constant 0 : index
    %c0_0 = arith.constant 0 : index
    %c0_1 = arith.constant 0 : index
    %0 = vector.load %arg1[%c0, %c0_0, %c0_1] : memref<1x16x128xf32, #tpu.memory_space<vmem>>, vector<1x16x128xf32>
    %cst = arith.constant dense<0.000000e+00> : vector<16xf32>
    %1 = vector.multi_reduction <add>, %0, %cst [0, 2] : vector<1x16x128xf32> to vector<16xf32>
    %2 = vector.shape_cast %1 : vector<16xf32> to vector<1x16x1xf32>
    %3 = arith.mulf %0, %0 : vector<1x16x128xf32>
    %cst_2 = arith.constant dense<0.000000e+00> : vector<16xf32>
    %4 = vector.multi_reduction <add>, %3, %cst_2 [0, 2] : vector<1x16x128xf32> to vector<16xf32>
    %5 = vector.shape_cast %4 : vector<16xf32> to vector<1x16x1xf32>
    %cst_3 = arith.constant 7.812500e-03 : f32
    %6 = vector.broadcast %cst_3 : f32 to vector<1x16x1xf32>
    %7 = arith.mulf %2, %6 : vector<1x16x1xf32>
    %cst_4 = arith.constant 7.812500e-03 : f32
    %8 = vector.broadcast %cst_4 : f32 to vector<1x16x1xf32>
    %9 = arith.mulf %5, %8 : vector<1x16x1xf32>
    %10 = arith.mulf %7, %7 : vector<1x16x1xf32>
    %11 = arith.subf %9, %10 : vector<1x16x1xf32>
    %cst_5 = arith.constant 0.000000e+00 : f32
    %12 = vector.broadcast %cst_5 : f32 to vector<1x16x1xf32>
    %13 = arith.maximumf %11, %12 : vector<1x16x1xf32>
    %cst_6 = arith.constant 9.99999974E-6 : f32
    %14 = vector.broadcast %cst_6 : f32 to vector<1x16x1xf32>
    %15 = arith.addf %13, %14 : vector<1x16x1xf32>
    %16 = math.rsqrt %15 : vector<1x16x1xf32>
    %c0_7 = arith.constant 0 : index
    %c0_8 = arith.constant 0 : index
    %17 = vector.load %arg2[%c0_7, %c0_8] : memref<16x1xf32, #tpu.memory_space<vmem>>, vector<16x1xf32>
    %18 = vector.shape_cast %17 : vector<16x1xf32> to vector<1x16x1xf32>
    %c0_9 = arith.constant 0 : index
    %c0_10 = arith.constant 0 : index
    %19 = vector.load %arg3[%c0_9, %c0_10] : memref<16x1xf32, #tpu.memory_space<vmem>>, vector<16x1xf32>
    %20 = vector.shape_cast %19 : vector<16x1xf32> to vector<1x16x1xf32>
    %21 = arith.mulf %18, %16 : vector<1x16x1xf32>
    %22 = arith.mulf %7, %21 : vector<1x16x1xf32>
    %23 = arith.subf %20, %22 : vector<1x16x1xf32>
    %24 = vector.broadcast %21 : vector<1x16x1xf32> to vector<1x16x128xf32>
    %25 = arith.mulf %0, %24 : vector<1x16x128xf32>
    %26 = vector.broadcast %23 : vector<1x16x1xf32> to vector<1x16x128xf32>
    %27 = arith.addf %25, %26 : vector<1x16x128xf32>
    %c0_11 = arith.constant 0 : index
    %c0_12 = arith.constant 0 : index
    %c0_13 = arith.constant 0 : index
    %28 = vector.load %arg4[%c0_11, %c0_12, %c0_13] : memref<1x16x128xf32, #tpu.memory_space<vmem>>, vector<1x16x128xf32>
    tpu.vector_store %arg4[%c0_11, %c0_12, %c0_13], %27 {strides = array<i32>} : memref<1x16x128xf32, #tpu.memory_space<vmem>>, vector<1x16x128xf32>,
    return
  }
  func.func @transform_0(%arg0: i32) -> (i32, i32, i32) {
    %c0_i32 = arith.constant 0 : i32
    %c0_i32_0 = arith.constant 0 : i32
    %c0_i32_1 = arith.constant 0 : i32
    return %c0_i32, %arg0, %c0_i32_0 : i32, i32, i32
  }
  func.func @transform_1(%arg0: i32) -> (i32, i32) {
    %c0_i32 = arith.constant 0 : i32
    %c0_i32_0 = arith.constant 0 : i32
    return %arg0, %c0_i32 : i32, i32
  }
  func.func @transform_2(%arg0: i32) -> (i32, i32) {
    %c0_i32 = arith.constant 0 : i32
    %c0_i32_0 = arith.constant 0 : i32
    return %arg0, %c0_i32 : i32, i32
  }
  func.func @transform_3(%arg0: i32) -> (i32, i32, i32) {
    %c0_i32 = arith.constant 0 : i32
    %c0_i32_0 = arith.constant 0 : i32
    %c0_i32_1 = arith.constant 0 : i32
    return %c0_i32, %arg0, %c0_i32_0 : i32, i32, i32
  }
}

</mosaic_0001>

<bundles_post_ra>
// kernel: tpu_custom_call.1
= control target key start
LH: loop header
LB: loop body
LE: loop exit
PB: predicated region body
PF: predicated region fallthrough
CT: control target
= control target key end

     0   :  { %8 = vsyncpa [#allocation3], 0  ;;  %s644_s0 = inlined_call_operand.vmem [shape: f32[1,32,128], index: 0, kind: input, shape index: {}]   ;;  %s645_s1 = inlined_call_operand.vmem [shape: f32[32,1], index: 1, kind: input, shape index: {}]   ;;  %s646_s2 = inlined_call_operand.vmem [shape: f32[32,1], index: 2, kind: input, shape index: {}]   ;;  %s647_s3 = inlined_call_operand.hbm [shape: f32[1,32,128], index: 3, kind: output, shape index: {}]  }
   0x1   :  { %10 = vsyncpa [#allocation3 + $0x1], 0  ;;  %s531_s12 = smov 0   ;;  %s533_s13 = smov 0  }
   0x2   :  { %s535_s14 = smov 0   ;;  %s537_s15 = smov 0  }
   0x3 LB: > { %s552_s16 = sadd.s32 4294967295, %s505_s15   ;;  %s378_s17 = sadd.s32 4294967294, %s505_s15   ;;  %s505_s15 = sphi %s537_s15, %s653_s15   ;;  %s501_s14 = sphi %s535_s14, %s652_s14   ;;  %s497_s13 = sphi %s533_s13, %s651_s13   ;;  %s493_s12 = sphi %s531_s12, %s650_s12  }
   0x4   : > { %s556_s18 = sadd.s32 1, %s505_s15   ;;  %s101_s19 = sadd.s32 1, %s501_s14 }
   0x5   : > { %s98_s20 = ssub.s32 %s505_s15, %s556_s18  ;;  %p111_p0 = scmp.ne.s32.totalorder %s501_s14, %s497_s13 }
   0x6   : > { %p99_p1 = scmp.eq.s32.totalorder %s98_s20, 0  ;;  %p112_p2 = scmp.eq.s32.totalorder %s552_s16, 1 }
   0x7   : > { %p117_p3 = scmp.ne.s32.totalorder %s497_s13, %s493_s12  ;;  %p118_p4 = scmp.eq.s32.totalorder %s378_s17, 1 }
   0x8   : > { %s567_s21 = scalar_select %p99_p1, %s501_s14, %s101_s19  }
   0x9   : > { %p569_p5 = por %p112_p2, %p111_p0  ;;  %p573_p6 = por %p118_p4, %p117_p3 }
   0xa   : > { %p381_p7 = scmp.ge.s32.totalorder %s505_s15, 1  ;;  %p163_p8 = scmp.lt.s32.totalorder %s505_s15, 3 }
   0xc   : > { %p164_p9 = pnand %p381_p7, %p163_p8 }
   0xd   : > { %s383_s24 = sshll.u32 (!%p164_p9), %s552_s16, 1  ;;  %v507_v4 = vmov (!%p164_p9), 0   ;;  %s194_s8 = sand.u32 (!%p164_p9), 1, %s497_s13  }
   0xe   : > { %167 = sbr.rel (%p164_p9) target bundleno = 347 (0x15b), region = 32  ;;  %p198_p10 = scmp.lt.s32.totalorder (!%p164_p9), %s383_s24, 3  ;;  %437 = vset.pattern.permute.xlu0 (!%p164_p9), %v507_v4  ;;  %438 = vset.pattern.permute.xlu1 (!%p164_p9), %v507_v4 }
   0xf   : > { %s382_s9 = sshll.u32 (!%p164_p9), %s194_s8, 4  ;;  %s394_s17 = sshll.u32 (!%p164_p9), %s552_s16, 8 }
  0x10   : > { %s196_s10 = scalar_lea.vmem (!%p164_p9), [#allocation2], %s382_s9  ;;  %s508_s16 = smov (!%p164_p9), [#allocation2]  }
  0x11   : > { %s292_s11 = sshll.u32 (!%p164_p9), %s196_s10, 4  ;;  %s447_s27 = sshll.u32 (!%p164_p9), %s508_s16, 4  ;;  %s596_s11 = int_to_ptr.vmem [resolvable:$true] %s292_s11  ;;  %s448_s27 = int_to_ptr.vmem [resolvable:$false] %s447_s27 }
  0x12   : > { %s443_s26 = scalar_lea.vmem (!%p164_p9), %s596_s11, 256  ;;  %p450_p0 = scmp.lt.s32.totalorder (!%p164_p9), %s596_s11, %s448_s27 }
  0x13   : > { %p444_p11 = scmp.ne.s32.totalorder (!%p164_p9), %s596_s11, %s443_s26 }
  0x15   : > { %s655_s24 = smov (!%p198_p10, %s383_s24), 3  ;;  %p445_p12 = pnand %p444_p11, %p569_p5 }
  0x16   : > { %s580_s25 = sshll.u32 %s655_s24, 3  ;;  %s601_s24 = scalar_lea.hbm %s647_s3, %s394_s17 }
  0x17   : > { %s201_s28 = scalar_lea.vmem %s644_s0, %s580_s25  ;;  %s207_s4 = scalar_lea.vmem %s645_s1, %s580_s25 }
  0x18   : > { %v216_v0 = vld [vmem:[%s201_s28] sm:$0xff]  ;;  %v217_v1 = vld [vmem:[%s201_s28 + $0x8] sm:$0xff]  ;;  %s213_s7 = scalar_lea.vmem %s646_s2, %s580_s25  ;;  %s603_s25 = scalar_lea.sflag [#allocation3], %s194_s8 }
  0x19   : > { %218 = vadd.xlane.f32.xlu0 %v216_v0  ;;  %v222_v2 = vmul.f32 %v216_v0, %v216_v0  ;;  %v223_v3 = vmul.f32 %v217_v1, %v217_v1  ;;  %v242_v21 = vld [vmem:[%s207_s4] sm:$0xff]  ;;  %v243_v24 = vld [vmem:[%s207_s4 + $0x8] sm:$0xff]  ;;  %p446_p13 = pneg %p445_p12  ;;  %s449_s28 = scalar_lea.vmem %s448_s27, 512 }
  0x1a   : > { %v244_v28 = vld [vmem:[%s213_s7] sm:$0xff]  ;;  %v245_v31 = vld [vmem:[%s213_s7 + $0x8] sm:$0xff]  ;;  %p451_p1 = scmp.lt.s32.totalorder %s449_s28, %s443_s26 }
  0x1b   : > { %224 = vadd.xlane.f32.xlu1 %v222_v2 }
  0x1c   : > { %p452_p2 = por %p451_p1, %p450_p0 }
  0x1d   : > { %220 = vadd.xlane.f32.xlu0 %v217_v1 }
  0x1e   : > { %p453_p3 = pnand %p452_p2, %p446_p13 }
  0x1f   : > { %226 = vadd.xlane.f32.xlu1 %v223_v3 }
  0xa6   : > { %v219_v5 = vpop.xlane.xlu0 %218 }
  0xa7   : > { %v228_v6 = vmul.f32 0.0078125, %v219_v5 }
  0xa8   : > { %v225_v7 = vpop.xlane.xlu1 %224 }
  0xa9   : > { %v232_v8 = vmul.f32 %v228_v6, %v228_v6  ;;  %v230_v9 = vmul.f32 0.0078125, %v225_v7 }
  0xaa   : > { %v221_v10 = vpop.xlane.xlu0 %220 }
  0xab   : > { %v234_v11 = vsub.f32 %v230_v9, %v232_v8  ;;  %v229_v12 = vmul.f32 0.0078125, %v221_v10 }
  0xac   : > { %v227_v13 = vpop.xlane.xlu1 %226 }
  0xad   : > { %v236_v14 = vmax.f32 %v234_v11, 0.0  ;;  %v233_v15 = vmul.f32 %v229_v12, %v229_v12  ;;  %v231_v16 = vmul.f32 0.0078125, %v227_v13 }
  0xaf   : > { %v238_v17 = vadd.f32 1e-05, %v236_v14  ;;  %v235_v18 = vsub.f32 %v231_v16, %v233_v15 }
  0xb1   : > { %439 = vrsqrt.f32 %v238_v17  ;;  %v237_v19 = vmax.f32 %v235_v18, 0.0 }
  0xb3   : > { %v239_v20 = vadd.f32 1e-05, %v237_v19 }
  0xb5   : > { %441 = vrsqrt.f32 %v239_v20 }
  0xbb   : > { %v440_v22 = vpop.eup %439 }
  0xbc   : > { %v246_v23 = vmul.f32 %v440_v22, %v242_v21 }
  0xbe   : > { %254 = vperm.xlu0 %437, %v246_v23   ;;  %v248_v27 = vmul.f32 %v246_v23, %v228_v6 }
  0xbf   : > { %v442_v25 = vpop.eup %441 }
  0xc0   : > { %v247_v26 = vmul.f32 %v442_v25, %v243_v24  ;;  %v250_v29 = vsub.f32 %v244_v28, %v248_v27 }
  0xc2   : > { %259 = vperm.xlu1 %438, %v247_v26   ;;  %v249_v30 = vmul.f32 %v247_v26, %v229_v12 }
  0xc4   : > { %v251_v32 = vsub.f32 %v245_v31, %v249_v30 }
  0xc6   : > { %266 = vperm.xlu1 %438, %v250_v29  }
  0xca   : > { %271 = vperm.xlu1 %438, %v251_v32  }
 0x13d   : > { %v255_v33 = vpop.permute.xlu0 %254 }
 0x13e   : > { %v262_v35 = vmul.f32 %v255_v33, %v216_v0 }
 0x141   : > { %v260_v34 = vpop.permute.xlu1 %259 }
 0x142   : > { %v263_v38 = vmul.f32 %v260_v34, %v217_v1 }
 0x145   : > { %v267_v36 = vpop.permute.xlu1 %266 }
 0x146   : > { %v274_v37 = vadd.f32 %v267_v36, %v262_v35 }
 0x148   : > { %276 = vst [vmem:[%s196_s10] sm:$0xff] %v274_v37 }
 0x149   : > { %v272_v39 = vpop.permute.xlu1 %271 }
 0x14a   : > { %v275_v40 = vadd.f32 %v272_v39, %v263_v38 }
 0x14c   : > { %277 = vst [vmem:[%s196_s10 + $0x8] sm:$0xff] %v275_v40 }
 0x14d   : > { %456 = shalt.err (!%p453_p3)
}
 0x14e   : > { %s457_s29 = scalar_lea.hbm %s601_s24, 256  ;;  %s461_s5 = scalar_lea.hbm %s647_s3, 512 }
 0x14f   : > { %p458_p4 = scmp.ne.s32.totalorder %s601_s24, %s457_s29  ;;  %p462_p9 = scmp.lt.u32.totalorder %s601_s24, %s647_s3 }
 0x150   : > { %p463_p10 = scmp.lt.u32.totalorder %s461_s5, %s457_s29  ;;  %p465_p12 = scmp.lt.u32.totalorder %s457_s29, %s601_s24 }
 0x151   : > { %p459_p7 = pnand %p458_p4, %p569_p5 }
 0x152   : > { %p464_p11 = por %p463_p10, %p462_p9 }
 0x153   : > { %p460_p8 = pneg %p459_p7 }
 0x154   : > { %p466_p13 = por %p465_p12, %p464_p11 }
 0x156   : > { %p467_p0 = pnand %p466_p13, %p460_p8 }
 0x158   : > { %470 = shalt.err (!%p467_p0)
}
 0x159   : > { %s509_s8 = smov 128   ;;  %s510_s9 = smov 8  }
 0x15a   : > { %395 = dma.vmem_to_hbm [thread:$0]  (%p569_p5), %s596_s11, 256, %s601_s24, %s603_s25, %s509_s8, %s509_s8, %s510_s9  }
 0x15b PF: > { %p401_p1 = scmp.ge.s32.totalorder %s505_s15, 2  ;;  %s307_s10 = sand.u32 1, %s493_s12  }
 0x15c   : > { %s308_s17 = scalar_lea.sflag [#allocation3], %s307_s10 }
 0x15d   : > { %p398_p2 = pnand %p401_p1, %p573_p6 }
 0x15f   : > { %488 = dma.done.wait (!%p398_p2), %s308_s17, 256  }
 0x160   : > { %490 = vsyncadd (!%p398_p2), %s308_s17, 4294967040  ;;  %p13_p3 = scmp.ge.s32.totalorder %s556_s18, 4   ;;  %s650_s12 = smov %s497_s13 }
 0x161   : > { %s651_s13 = smov %s501_s14  ;;  %s652_s14 = smov %s567_s21 }
 0x162   : > { %s653_s15 = smov %s556_s18  ;;  %15 = sbr.rel (!%p13_p3) target bundleno = 3 (0x3), region = 73 }
 0x169   :  { %313 = vsyncpa [#allocation3], 1 }
 0x16a   :  { %315 = vsyncpa [#allocation3 + $0x1], 1 }

</bundles_post_ra>
